<compile_context>
chip_gen: v6e
topology: v6e:2x2x1
jax: 0.10.0
libtpu: 0.0.40
codegen_flags: <defaults>
</compile_context>

<pallas_src>
import math
import jax
import jax.numpy as jnp
from jax import lax
from jax.experimental import pallas as pl
from jax.experimental.pallas import tpu as pltpu

_INV_SQRT2 = 1.0 / math.sqrt(2.0)


def _gelu_exact(x):
    # Matches torch.nn.GELU() default (erf-based, exact), computed in f32.
    return 0.5 * x * (1.0 + lax.erf(x * _INV_SQRT2))


def ffn_kernel(x_ref, w1_ref, b1_ref, w2_ref, b2_ref, o_ref, acc_ref):
    # x_ref:   (tm, d_model)   native dtype
    # w1_ref:  (tk, d_model)   chunk of fc1 weight (PyTorch (out,in) layout)
    # b1_ref:  (1, tk)
    # w2_ref:  (d_model, tk)   chunk of fc2 weight (PyTorch (out,in) layout)
    # b2_ref:  (1, d_model)
    # acc_ref: (tm, d_model)   f32 accumulator scratch
    k = pl.program_id(1)

    @pl.when(k == 0)
    def _():
        acc_ref[...] = jnp.zeros_like(acc_ref)

    x = x_ref[...]
    w1 = w1_ref[...]
    # h = x @ w1^T  (contract last dims of both; f32 accumulate on the MXU)
    h = lax.dot_general(x, w1, (((1,), (1,)), ((), ())),
                        preferred_element_type=jnp.float32)
    h = _gelu_exact(h + b1_ref[...].astype(jnp.float32))
    # dropout: identity (eval mode)

    w2 = w2_ref[...]
    # acc += h @ w2^T  (feed MXU in the weight dtype; accumulate f32)
    acc_ref[...] += lax.dot_general(h.astype(w2.dtype), w2,
                                    (((1,), (1,)), ((), ())),
                                    preferred_element_type=jnp.float32)

    @pl.when(k == pl.num_programs(1) - 1)
    def _():
        o_ref[...] = (acc_ref[...] + b2_ref[...].astype(jnp.float32)
                      ).astype(o_ref.dtype)


def _pick_middle_chunk(middle):
    # Chunk must evenly divide `middle` (the per-chunk GELU + accumulate is only
    # exact on whole columns) and keep the lane dim a multiple of 128.
    for cand in (512, 256, 128):
        if middle >= cand and middle % cand == 0:
            return cand
    return middle


def feed_forward(x, w1, b1, w2, b2, *, tm=None, tk=None):
    """
    x:  (..., d_model)
    w1: (middle, d_model), b1: (middle,)   -- PyTorch nn.Linear layout
    w2: (d_model, middle), b2: (d_model,)
    """
    d_model = x.shape[-1]
    middle = w1.shape[0]
    lead_shape = x.shape[:-1]
    M = math.prod(lead_shape) if lead_shape else 1

    x2 = x.reshape(M, d_model)
    b1_2 = b1.reshape(1, middle)
    b2_2 = b2.reshape(1, d_model)

    if tm is None:
        tm = 256 if M >= 256 else M          # MXU-shaped row tile; ragged tail masked
    if tk is None:
        tk = _pick_middle_chunk(middle)

    grid = (pl.cdiv(M, tm), middle // tk)    # (rows: parallel, middle: reduction)

    out = pl.pallas_call(
        ffn_kernel,
        out_shape=jax.ShapeDtypeStruct((M, d_model), x.dtype),
        grid_spec=pltpu.PrefetchScalarGridSpec(
            num_scalar_prefetch=0,
            grid=grid,
            in_specs=[
                pl.BlockSpec((tm, d_model), lambda i, k: (i, 0)),   # x rows
                pl.BlockSpec((tk, d_model), lambda i, k: (k, 0)),   # W1 chunk
                pl.BlockSpec((1, tk),       lambda i, k: (0, k)),   # b1 chunk
                pl.BlockSpec((d_model, tk), lambda i, k: (0, k)),   # W2 chunk
                pl.BlockSpec((1, d_model),  lambda i, k: (0, 0)),   # b2
            ],
            out_specs=pl.BlockSpec((tm, d_model), lambda i, k: (i, 0)),
            scratch_shapes=[pltpu.VMEM((tm, d_model), jnp.float32)],
        ),
        compiler_params=pltpu.CompilerParams(
            dimension_semantics=("parallel", "arbitrary"),
            vmem_limit_bytes=48 * 1024 * 1024,
        ),
    )(x2, w1, b1_2, w2, b2_2)

    return out.reshape(*lead_shape, d_model)


def _reference(x, w1, b1, w2, b2):
    h = jnp.einsum("...d,md->...m", x, w1) + b1
    h = _gelu_exact(h)
    return jnp.einsum("...m,dm->...d", h, w2) + b2


if __name__ == "__main__":
    # Small shapes consistent with the module: (batch=2, seq=8, d_model=32),
    # middle_dim=64, dropout=0.1 (identity at inference).
    d_model, middle_dim = 32, 64
    batch, seq = 2, 8

    key = jax.random.PRNGKey(0)
    kx, k1, kb1, k2, kb2 = jax.random.split(key, 5)

    x = jax.random.normal(kx, (batch, seq, d_model), dtype=jnp.float32)

    # Deterministic init mimicking torch.nn.Linear (uniform +/- 1/sqrt(fan_in)).
    lim1 = 1.0 / math.sqrt(d_model)
    lim2 = 1.0 / math.sqrt(middle_dim)
    w1 = jax.random.uniform(k1, (middle_dim, d_model), minval=-lim1, maxval=lim1)
    b1 = jax.random.uniform(kb1, (middle_dim,), minval=-lim1, maxval=lim1)
    w2 = jax.random.uniform(k2, (d_model, middle_dim), minval=-lim2, maxval=lim2)
    b2 = jax.random.uniform(kb2, (d_model,), minval=-lim2, maxval=lim2)

    out = feed_forward(x, w1, b1, w2, b2)
    out = jax.block_until_ready(out)

    ref = _reference(x, w1, b1, w2, b2)
    assert out.shape == x.shape
    assert jnp.allclose(out, ref, atol=1e-5, rtol=1e-5)

    print("KERNEL_OK")
</pallas_src>

<mosaic_0001>
module attributes {stable_mosaic.version = 11 : i64} {
  func.func @ffn_kernel(%arg0: i32, %arg1: i32, %arg2: memref<16x32xf32, #tpu.memory_space<vmem>>, %arg3: memref<64x32xf32, #tpu.memory_space<vmem>>, %arg4: memref<1x64xf32, #tpu.memory_space<vmem>>, %arg5: memref<32x64xf32, #tpu.memory_space<vmem>>, %arg6: memref<1x32xf32, #tpu.memory_space<vmem>>, %arg7: memref<16x32xf32, #tpu.memory_space<vmem>>, %arg8: memref<16x32xf32, #tpu.memory_space<vmem>>) attributes {dimension_semantics = [#tpu.dimension_semantics<parallel>, #tpu.dimension_semantics<arbitrary>], iteration_bounds = array<i64: 1, 1>, scalar_prefetch = 0 : i64, scratch_operands = 1 : i64, tpu.core_type = #tpu.core_type<tc>, window_params = [{transform_indices = @transform_0, window_bounds = array<i64: 16, 32>}, {transform_indices = @transform_1, window_bounds = array<i64: 64, 32>}, {transform_indices = @transform_2, window_bounds = array<i64: 1, 64>}, {transform_indices = @transform_3, window_bounds = array<i64: 32, 64>}, {pipeline_mode = #tpu.pipeline_mode<synchronous>, transform_indices = @transform_4, window_bounds = array<i64: 1, 32>}, {transform_indices = @transform_5, window_bounds = array<i64: 16, 32>}]} {
    %c0_i32 = arith.constant 0 : i32
    %0 = arith.cmpi eq, %arg1, %c0_i32 : i32
    %1 = arith.extui %0 : i1 to i32
    %c0_i32_0 = arith.constant 0 : i32
    %2 = arith.cmpi ne, %1, %c0_i32_0 : i32
    scf.if %2 {
      %cst_18 = arith.constant 0.000000e+00 : f32
      %25 = vector.broadcast %cst_18 : f32 to vector<16x32xf32>
      %c0_19 = arith.constant 0 : index
      %c0_20 = arith.constant 0 : index
      %26 = vector.load %arg8[%c0_19, %c0_20] : memref<16x32xf32, #tpu.memory_space<vmem>>, vector<16x32xf32>
      tpu.vector_store %arg8[%c0_19, %c0_20], %25 {strides = array<i32>} : memref<16x32xf32, #tpu.memory_space<vmem>>, vector<16x32xf32>,
    } else {
    }
    %c0 = arith.constant 0 : index
    %c0_1 = arith.constant 0 : index
    %3 = vector.load %arg2[%c0, %c0_1] : memref<16x32xf32, #tpu.memory_space<vmem>>, vector<16x32xf32>
    %c0_2 = arith.constant 0 : index
    %c0_3 = arith.constant 0 : index
    %4 = vector.load %arg3[%c0_2, %c0_3] : memref<64x32xf32, #tpu.memory_space<vmem>>, vector<64x32xf32>
    %cst = arith.constant dense<0.000000e+00> : vector<16x64xf32>
    %5 = tpu.matmul %3, %4, %cst {dimension_numbers = #tpu.dot_dimension_numbers<[1], [1], [0], [0], [0, 0, 1, 0], [], []>} : vector<16x32xf32>, vector<64x32xf32>, vector<16x64xf32> -> vector<16x64xf32>
    %c0_4 = arith.constant 0 : index
    %c0_5 = arith.constant 0 : index
    %6 = vector.load %arg4[%c0_4, %c0_5] : memref<1x64xf32, #tpu.memory_space<vmem>>, vector<1x64xf32>
    %7 = vector.broadcast %6 : vector<1x64xf32> to vector<16x64xf32>
    %8 = arith.addf %5, %7 : vector<16x64xf32>
    %cst_6 = arith.constant 5.000000e-01 : f32
    %9 = vector.broadcast %cst_6 : f32 to vector<16x64xf32>
    %10 = arith.mulf %9, %8 : vector<16x64xf32>
    %cst_7 = arith.constant 0.707106769 : f32
    %11 = vector.broadcast %cst_7 : f32 to vector<16x64xf32>
    %12 = arith.mulf %8, %11 : vector<16x64xf32>
    %13 = math.erf %12 : vector<16x64xf32>
    %cst_8 = arith.constant 1.000000e+00 : f32
    %14 = vector.broadcast %cst_8 : f32 to vector<16x64xf32>
    %15 = arith.addf %14, %13 : vector<16x64xf32>
    %16 = arith.mulf %10, %15 : vector<16x64xf32>
    %c0_9 = arith.constant 0 : index
    %c0_10 = arith.constant 0 : index
    %17 = vector.load %arg5[%c0_9, %c0_10] : memref<32x64xf32, #tpu.memory_space<vmem>>, vector<32x64xf32>
    %c0_11 = arith.constant 0 : index
    %c0_12 = arith.constant 0 : index
    %18 = vector.load %arg8[%c0_11, %c0_12] : memref<16x32xf32, #tpu.memory_space<vmem>>, vector<16x32xf32>
    %cst_13 = arith.constant dense<0.000000e+00> : vector<16x32xf32>
    %19 = tpu.matmul %16, %17, %cst_13 {dimension_numbers = #tpu.dot_dimension_numbers<[1], [1], [0], [0], [0, 0, 1, 0], [], []>} : vector<16x64xf32>, vector<32x64xf32>, vector<16x32xf32> -> vector<16x32xf32>
    %20 = arith.addf %18, %19 : vector<16x32xf32>
    %c0_14 = arith.constant 0 : index
    %c0_15 = arith.constant 0 : index
    %21 = vector.load %arg8[%c0_14, %c0_15] : memref<16x32xf32, #tpu.memory_space<vmem>>, vector<16x32xf32>
    tpu.vector_store %arg8[%c0_14, %c0_15], %20 {strides = array<i32>} : memref<16x32xf32, #tpu.memory_space<vmem>>, vector<16x32xf32>,
    %c0_i32_16 = arith.constant 0 : i32
    %22 = arith.cmpi eq, %arg1, %c0_i32_16 : i32
    %23 = arith.extui %22 : i1 to i32
    %c0_i32_17 = arith.constant 0 : i32
    %24 = arith.cmpi ne, %23, %c0_i32_17 : i32
    scf.if %24 {
      %c0_18 = arith.constant 0 : index
      %c0_19 = arith.constant 0 : index
      %25 = vector.load %arg8[%c0_18, %c0_19] : memref<16x32xf32, #tpu.memory_space<vmem>>, vector<16x32xf32>
      %c0_20 = arith.constant 0 : index
      %c0_21 = arith.constant 0 : index
      %26 = vector.load %arg6[%c0_20, %c0_21] : memref<1x32xf32, #tpu.memory_space<vmem>>, vector<1x32xf32>
      %27 = vector.broadcast %26 : vector<1x32xf32> to vector<16x32xf32>
      %28 = arith.addf %25, %27 : vector<16x32xf32>
      %c0_22 = arith.constant 0 : index
      %c0_23 = arith.constant 0 : index
      %29 = vector.load %arg7[%c0_22, %c0_23] : memref<16x32xf32, #tpu.memory_space<vmem>>, vector<16x32xf32>
      tpu.vector_store %arg7[%c0_22, %c0_23], %28 {strides = array<i32>} : memref<16x32xf32, #tpu.memory_space<vmem>>, vector<16x32xf32>,
    } else {
    }
    return
  }
  func.func @transform_0(%arg0: i32, %arg1: i32) -> (i32, i32) {
    %c0_i32 = arith.constant 0 : i32
    %c0_i32_0 = arith.constant 0 : i32
    return %arg0, %c0_i32 : i32, i32
  }
  func.func @transform_1(%arg0: i32, %arg1: i32) -> (i32, i32) {
    %c0_i32 = arith.constant 0 : i32
    %c0_i32_0 = arith.constant 0 : i32
    return %arg1, %c0_i32 : i32, i32
  }
  func.func @transform_2(%arg0: i32, %arg1: i32) -> (i32, i32) {
    %c0_i32 = arith.constant 0 : i32
    %c0_i32_0 = arith.constant 0 : i32
    return %c0_i32, %arg1 : i32, i32
  }
  func.func @transform_3(%arg0: i32, %arg1: i32) -> (i32, i32) {
    %c0_i32 = arith.constant 0 : i32
    %c0_i32_0 = arith.constant 0 : i32
    return %c0_i32, %arg1 : i32, i32
  }
  func.func @transform_4(%arg0: i32, %arg1: i32) -> (i32, i32) {
    %c0_i32 = arith.constant 0 : i32
    %c0_i32_0 = arith.constant 0 : i32
    %c0_i32_1 = arith.constant 0 : i32
    return %c0_i32, %c0_i32_0 : i32, i32
  }
  func.func @transform_5(%arg0: i32, %arg1: i32) -> (i32, i32) {
    %c0_i32 = arith.constant 0 : i32
    %c0_i32_0 = arith.constant 0 : i32
    return %arg0, %c0_i32 : i32, i32
  }
}

</mosaic_0001>

<bundles_post_ra>
// kernel: tpu_custom_call.1
= control target key start
LH: loop header
LB: loop body
LE: loop exit
PB: predicated region body
PF: predicated region fallthrough
CT: control target
= control target key end

     0   :  { %vm25_vm0 = vcmask 261120   ;;  %s510_s0 = inlined_call_operand.vmem [shape: f32[16,32], index: 0, kind: input, shape index: {}]   ;;  %s511_s1 = inlined_call_operand.vmem [shape: f32[64,32], index: 1, kind: input, shape index: {}]   ;;  %s512_s2 = inlined_call_operand.vmem [shape: f32[1,64], index: 2, kind: input, shape index: {}]   ;;  %s513_s3 = inlined_call_operand.vmem [shape: f32[32,64], index: 3, kind: input, shape index: {}]   ;;  %s514_s4 = inlined_call_operand.vmem [shape: f32[1,32], index: 4, kind: input, shape index: {}]   ;;  %s515_s5 = inlined_call_operand.hbm [shape: f32[16,32], index: 5, kind: output, shape index: {}]  }
   0x1   :  { %v37_v0 = vld [vmem:[%s511_s1 + $0x38] sm:$0xff]  ;;  %v36_v1 = vld [vmem:[%s511_s1 + $0x30] sm:$0xff]  ;;  %v28_v2 = vld [vmem:[%s510_s0] sm:$0xff] }
   0x2   :  { %331 = vmatprep.subr.msk.mxu0 %vm25_vm0, %v37_v0  ;;  %347 = vmatprep.mubr.msk.f32.mxu0 %vm25_vm0, %v28_v2 }
   0x3   :  { %332 = vmatpush3.xpose.msk.msra.mxu0 %vm25_vm0, %v37_v0 }
   0x4   :  { %333 = vmatprep.subr.msk.mxu0 %vm25_vm0, %v36_v1 }
   0x5   :  { %10 = vsyncpa [#allocation4], 0  ;;  %v35_v3 = vld [vmem:[%s511_s1 + $0x28] sm:$0xff]  ;;  %v34_v4 = vld [vmem:[%s511_s1 + $0x20] sm:$0xff]  ;;  %vm167_vm1 = vcmask 523264   ;;  %v391_v14 = vmov 0.0  }
   0x6   :  { %v33_v5 = vld [vmem:[%s511_s1 + $0x18] sm:$0xff]  ;;  %v32_v6 = vld [vmem:[%s511_s1 + $0x10] sm:$0xff]  ;;  %v31_v7 = vld [vmem:[%s511_s1 + $0x8] sm:$0xff]  ;;  %27 = vst.msk [vmem:[#allocation2 + $0x8] sm:$0xff] %vm25_vm0, %v391_v14  ;;  %s392_s21 = smov [#allocation3]  }
   0x7   :  { %334 = vmatpush3.xpose.msk.msra.mxu0 %vm25_vm0, %v36_v1  ;;  %v30_v8 = vld [vmem:[%s511_s1] sm:$0xff]  ;;  %v29_v9 = vld [vmem:[%s510_s0 + $0x8] sm:$0xff]  ;;  %v164_v10 = vld [vmem:[%s513_s3 + $0x18] sm:$0xff]  ;;  %26 = vst.msk [vmem:[#allocation2] sm:$0xff] %vm25_vm0, %v391_v14  ;;  %s286_s22 = sshll.u32 %s392_s21, 4  ;;  %s287_s22 = int_to_ptr.vmem [resolvable:$true] %s286_s22 }
   0x8   :  { %335 = vmatprep.subr.msk.mxu0 %vm25_vm0, %v35_v3  ;;  %350 = vmatprep.subr.msk.mxu1 %vm167_vm1, %v164_v10  ;;  %v163_v11 = vld [vmem:[%s513_s3 + $0x10] sm:$0xff]  ;;  %v162_v12 = vld [vmem:[%s513_s3 + $0x8] sm:$0xff]  ;;  %v161_v13 = vld [vmem:[%s513_s3] sm:$0xff]  ;;  %s369_s23 = scalar_lea.vmem %s287_s22, 256  ;;  %p374_p1 = scmp.lt.s32.totalorder %s287_s22, %s287_s22 }
   0x9   :  { %351 = vmatpush3.xpose.msk.msra.mxu1 %vm167_vm1, %v164_v10  ;;  %v297_v15 = vld [vmem:[%s512_s2] ss:$0 sm:$0xff]  ;;  %p370_p0 = scmp.ne.s32.totalorder %s287_s22, %s369_s23  ;;  %p375_p2 = scmp.lt.s32.totalorder %s369_s23, %s369_s23 }
   0xa   :  { %352 = vmatprep.subr.msk.mxu1 %vm167_vm1, %v163_v11  ;;  %v314_v36 = vld [vmem:[%s514_s4] ss:$0 sm:$0xff] }
   0xb   :  { %336 = vmatpush3.xpose.msk.msra.mxu0 %vm25_vm0, %v35_v3  ;;  %p376_p3 = por %p375_p2, %p374_p1 }
   0xc   :  { %337 = vmatprep.subr.msk.mxu0 %vm25_vm0, %v34_v4 }
   0xd   :  { %353 = vmatpush3.xpose.msk.msra.mxu1 %vm167_vm1, %v163_v11  ;;  %v166_v30 = vld [vmem:[#allocation2 + $0x8] sm:$0xff]  ;;  %p377_p4 = pnand %p376_p3, %p370_p0 }
   0xe   :  { %354 = vmatprep.subr.msk.mxu1 %vm167_vm1, %v162_v12  ;;  %v165_v32 = vld [vmem:[#allocation2] sm:$0xff] }
   0xf   :  { %338 = vmatpush3.xpose.msk.msra.mxu0 %vm25_vm0, %v34_v4 }
  0x10   :  { %339 = vmatprep.subr.msk.mxu0 %vm25_vm0, %v33_v5 }
  0x11   :  { %355 = vmatpush3.xpose.msk.msra.mxu1 %vm167_vm1, %v162_v12 }
  0x12   :  { %356 = vmatprep.subr.msk.mxu1 %vm167_vm1, %v161_v13 }
  0x13   :  { %340 = vmatpush3.xpose.msk.msra.mxu0 %vm25_vm0, %v33_v5 }
  0x14   :  { %341 = vmatprep.subr.msk.mxu0 %vm25_vm0, %v32_v6 }
  0x15   :  { %357 = vmatpush3.xpose.msk.msra.mxu1 %vm167_vm1, %v161_v13 }
  0x17   :  { %342 = vmatpush3.xpose.msk.msra.mxu0 %vm25_vm0, %v32_v6 }
  0x18   :  { %343 = vmatprep.subr.msk.mxu0 %vm25_vm0, %v31_v7 }
  0x1b   :  { %344 = vmatpush3.xpose.msk.msra.mxu0 %vm25_vm0, %v31_v7 }
  0x1c   :  { %345 = vmatprep.subr.msk.mxu0 %vm25_vm0, %v30_v8 }
  0x1f   :  { %346 = vmatpush3.xpose.msk.msra.mxu0 %vm25_vm0, %v30_v8 }
  0x22   :  { %348 = vmatmul.mubr.msk.f32.vlgmr.msra.gmra.mxu0 %vm25_vm0, %v29_v9 }
  0xe2   :  { %v349_v16 = vpop.f32.mrf.mxu0 }
  0xe3   :  { %v148_v17 = vadd.f32 %v349_v16, %v297_v15 }
  0xe4   :  { %v142_v18 = vpop.f32.mrf.mxu0 }
  0xe5   :  { %v154_v19 = vmul.f32 0.70710677, %v148_v17  ;;  %v143_v20 = vadd.f32 %v297_v15, %v142_v18  ;;  %v152_v27 = vmul.f32 0.5, %v148_v17 }
  0xe7   :  { %365 = verf.f32 %v154_v19  ;;  %v153_v21 = vmul.f32 0.70710677, %v143_v20  ;;  %v151_v25 = vmul.f32 0.5, %v143_v20 }
  0xe9   :  { %367 = verf.f32 %v153_v21 }
  0xf4   :  { %v366_v22 = vpop.eup %365 }
  0xf5   :  { %v158_v24 = vadd.f32 1.0, %v366_v22 }
  0xf6   :  { %v368_v23 = vpop.eup %367 }
  0xf7   :  { %v157_v26 = vadd.f32 1.0, %v368_v23  ;;  %v160_v29 = vmul.f32 %v158_v24, %v152_v27 }
  0xf9   :  { %v159_v28 = vmul.f32 %v157_v26, %v151_v25 }
  0xfb   :  { %358 = vmatprep.mubr.msk.f32.mxu1 %vm167_vm1, %v159_v28 }
  0xfc   :  { %359 = vmatmul.mubr.msk.f32.vlgmr.msra.gmra.mxu1 %vm167_vm1, %v160_v29 }
 0x1bc   :  { %v360_v31 = vpop.f32.mrf.mxu1 }
 0x1bd   :  { %v262_v33 = vadd.f32 %v360_v31, %v166_v30 }
 0x1be   :  { %v252_v34 = vpop.f32.mrf.mxu1 }
 0x1bf   :  { %264 = vst.msk [vmem:[#allocation2 + $0x8] sm:$0xff] %vm25_vm0, %v262_v33  ;;  %v261_v35 = vadd.f32 %v252_v34, %v165_v32 }
 0x1c1   :  { %263 = vst.msk [vmem:[#allocation2] sm:$0xff] %vm25_vm0, %v261_v35 }
 0x1c6   :  { %v269_v37 = vld [vmem:[#allocation2 + $0x8] sm:$0xff] }
 0x1c7   :  { %v278_v38 = vadd.f32 %v314_v36, %v269_v37 }
 0x1c8   :  { %v268_v39 = vld [vmem:[#allocation2] sm:$0xff] }
 0x1c9   :  { %v277_v40 = vadd.f32 %v314_v36, %v268_v39  ;;  %280 = vst.msk [vmem:[#allocation3 + $0x8] sm:$0xff] %vm25_vm0, %v278_v38 }
 0x1cb   :  { %279 = vst.msk [vmem:[#allocation3] sm:$0xff] %vm25_vm0, %v277_v40 }
 0x1cc   :  { %380 = shalt.err (!%p377_p4)
}
 0x1cd   :  { %s393_s24 = smov 128   ;;  %s394_s4 = smov 8  }
 0x1ce   :  { %292 = dma.vmem_to_hbm [thread:$0]  %s287_s22, 256, %s515_s5, [#allocation4], %s393_s24, %s393_s24, %s394_s4  }
 0x1cf   :  { %389 = dma.done.wait [#allocation4], 256  }
 0x1d0   :  { %390 = vsyncadd [#allocation4], 4294967040 }
 0x1d1   :  { %296 = vsyncpa [#allocation4], 1 }

</bundles_post_ra>
